<compile_context>
chip_gen: v7x
topology: tpu7x:2x2x1
jax: 0.10.0
libtpu: 0.0.40
codegen_flags: <defaults>
</compile_context>

<pallas_src>
import functools

import jax
import jax.numpy as jnp
import numpy as np
from jax.experimental import pallas as pl
from jax.experimental.pallas import tpu as pltpu


def _birnn_kernel(x_ref, wx_ref, whh_ref, b_ref, h0_ref,
                  out_ref, fH_ref, bH_ref,
                  aligned_ref, states_ref, *, T, Bp, H):
    """Shapes:
       x_ref:   (T*Bp, D)  bf16    wx_ref: (D, 2H) bf16   whh_ref: (2H, 2H) bf16
       b_ref:   (1, 2H)    f32     h0_ref: (Bp, 2H) f32
       out_ref: (T*Bp, 2H) f32     fH_ref/bH_ref: (Bp, H) f32
       aligned_ref / states_ref: (T*Bp, 2H) f32 VMEM scratch
    """
    H2 = 2 * H

    # ---- Hoisted input projection: ONE MXU matmul for all timesteps and both
    # directions (bf16 operands, f32 accumulation), bias folded in.
    proj = jnp.dot(x_ref[...], wx_ref[...],
                   preferred_element_type=jnp.float32) + b_ref[...]      # (T*Bp, 2H)

    # ---- One-time alignment pass (off the serial chain): aligned row block t
    # holds [proj_f(t) | proj_b(T-1-t)], so the recurrence reads a single
    # contiguous, sublane-aligned, full-width slab per step.
    for t in range(T):
        fwd = proj[t * Bp:(t + 1) * Bp, :H]
        bwd = proj[(T - 1 - t) * Bp:(T - t) * Bp, H:]
        aligned_ref[pl.ds(t * Bp, Bp), :] = jnp.concatenate([fwd, bwd], axis=-1)

    whh = whh_ref[...]   # hoisted bf16 block-diagonal recurrent weight (2H, 2H)
    # NOTE: holding W_hh in MXU weight registers (pltpu.matmul_push_rhs /
    # matmul_acc_lhs / matmul_pop) would remove the per-step weight load from
    # the serial chain; jnp.dot kept for portable lowering across v5e/v6e/v7x.

    def step(t, h):
        # Single fused fwd+bwd recurrent matmul (block-diag W_hh): bf16 MXU
        # operands, f32 accumulation; h / add / tanh stay in f32.
        rec = jnp.dot(h.astype(whh.dtype), whh,
                      preferred_element_type=jnp.float32)                # (Bp, 2H)
        off = pl.multiple_of(t * Bp, Bp)          # Bp is a multiple of 8: aligned
        h_new = jnp.tanh(rec + aligned_ref[pl.ds(off, Bp), :])           # (Bp, 2H)
        # One full-width, sublane-aligned VMEM store per step; HBM output
        # writes are batched after the loop, off the recurrence.
        states_ref[pl.ds(off, Bp), :] = h_new
        return h_new

    # Partial unroll: full unroll for short T, bounded code size for long T.
    h_final = jax.lax.fori_loop(0, T, step, h0_ref[...], unroll=min(T, 8))

    # ---- Bulk writeback (one-time): forward halves straight, backward halves
    # time-reversed, straight into the final time-aligned (T*Bp, 2H) layout.
    for t in range(T):
        dst = t * Bp
        src = (T - 1 - t) * Bp
        out_ref[pl.ds(dst, Bp), :] = jnp.concatenate(
            [states_ref[pl.ds(dst, Bp), pl.ds(0, H)],
             states_ref[pl.ds(src, Bp), pl.ds(H, H)]], axis=-1)

    fH_ref[...] = h_final[:, :H]
    bH_ref[...] = h_final[:, H:]


def birnn_forward(inputs, params, Hs=None):
    """Pallas BiRNN forward. Returns (outputs (T, B, 2H), (f_H, b_H))."""
    T, B, D = inputs.shape
    H = params["W_xh_f"].shape[1]
    H2 = 2 * H
    Bp = ((B + 7) // 8) * 8          # pad batch to the 8-sublane tile

    f_H0 = jnp.zeros((B, H), jnp.float32) if Hs is None else Hs[0]
    b_H0 = jnp.zeros((B, H), jnp.float32) if Hs is None else Hs[1]

    # One-time parameter packing / casting (pure layout, runs once outside).
    wx = jnp.concatenate([params["W_xh_f"], params["W_xh_b"]],
                         axis=1).astype(jnp.bfloat16)                     # (D, 2H)
    zhh = jnp.zeros((H, H), jnp.float32)
    whh = jnp.block([[params["W_hh_f"], zhh],
                     [zhh, params["W_hh_b"]]]).astype(jnp.bfloat16)       # (2H, 2H)
    bias = jnp.concatenate([params["b_h_f"], params["b_h_b"]]
                           ).astype(jnp.float32).reshape(1, H2)           # (1, 2H)
    h0 = jnp.concatenate([f_H0, b_H0], axis=1).astype(jnp.float32)        # (B, 2H)

    pad_b = Bp - B
    x = inputs
    if pad_b:
        x = jnp.pad(x, ((0, 0), (0, pad_b), (0, 0)))
        h0 = jnp.pad(h0, ((0, pad_b), (0, 0)))
    x2d = x.reshape(T * Bp, D).astype(jnp.bfloat16)      # row-major, free

    kernel = functools.partial(_birnn_kernel, T=T, Bp=Bp, H=H)

    # Generation-aware VMEM budget: explicit limit (v5e's default scoped limit
    # is only 16 MiB) computed from resident operands + scratch with headroom.
    def nbytes(n, dt):
        return int(n) * jnp.dtype(dt).itemsize
    io_bytes = (nbytes(T * Bp * D, jnp.bfloat16) + nbytes(D * H2, jnp.bfloat16)
                + nbytes(H2 * H2, jnp.bfloat16) + nbytes(H2, jnp.float32)
                + nbytes(Bp * H2, jnp.float32) + nbytes(T * Bp * H2, jnp.float32)
                + 2 * nbytes(Bp * H, jnp.float32))
    scratch_bytes = 2 * nbytes(T * Bp * H2, jnp.float32)
    vmem_limit = int(min(max(2 * io_bytes + scratch_bytes + (4 << 20), 16 << 20),
                         64 << 20))

    grid_spec = pltpu.PrefetchScalarGridSpec(
        num_scalar_prefetch=0,
        grid=(1,),
        in_specs=[
            pl.BlockSpec((T * Bp, D), lambda i: (0, 0)),   # x (passed once)
            pl.BlockSpec((D, H2), lambda i: (0, 0)),       # [W_xh_f | W_xh_b]
            pl.BlockSpec((H2, H2), lambda i: (0, 0)),      # block-diag W_hh
            pl.BlockSpec((1, H2), lambda i: (0, 0)),       # [b_f | b_b]
            pl.BlockSpec((Bp, H2), lambda i: (0, 0)),      # [f_H0 | b_H0]
        ],
        out_specs=[
            pl.BlockSpec((T * Bp, H2), lambda i: (0, 0)),  # time-aligned outputs
            pl.BlockSpec((Bp, H), lambda i: (0, 0)),       # final forward state
            pl.BlockSpec((Bp, H), lambda i: (0, 0)),       # final backward state
        ],
        scratch_shapes=[pltpu.VMEM((T * Bp, H2), jnp.float32),   # aligned proj
                        pltpu.VMEM((T * Bp, H2), jnp.float32)],  # per-step states
    )

    out2d, f_H, b_H = pl.pallas_call(
        kernel,
        grid_spec=grid_spec,
        out_shape=[
            jax.ShapeDtypeStruct((T * Bp, H2), jnp.float32),
            jax.ShapeDtypeStruct((Bp, H), jnp.float32),
            jax.ShapeDtypeStruct((Bp, H), jnp.float32),
        ],
        compiler_params=pltpu.CompilerParams(
            dimension_semantics=("arbitrary",),     # serial recurrence inside
            vmem_limit_bytes=vmem_limit),
    )(x2d, wx, whh, bias, h0)

    outputs = out2d.reshape(T, Bp, H2)[:, :B, :]    # drop batch padding
    return outputs, (f_H[:B], b_H[:B])


def birnn_reference(inputs, params, Hs=None):
    """Pure-JAX f32 reference mirroring the PyTorch forward semantics."""
    T, B, D = inputs.shape
    H = params["W_xh_f"].shape[1]
    f_H = jnp.zeros((B, H), jnp.float32) if Hs is None else Hs[0]
    b_H = jnp.zeros((B, H), jnp.float32) if Hs is None else Hs[1]

    def step(h, x, Wx, Wh, b):
        return jnp.tanh(x @ Wx + h @ Wh + b)

    def f_scan(h, x):
        h = step(h, x, params["W_xh_f"], params["W_hh_f"], params["b_h_f"])
        return h, h

    def b_scan(h, x):
        h = step(h, x, params["W_xh_b"], params["W_hh_b"], params["b_h_b"])
        return h, h

    f_H, f_outs = jax.lax.scan(f_scan, f_H, inputs)
    b_H, b_outs = jax.lax.scan(b_scan, b_H, inputs[::-1])
    outputs = jnp.concatenate([f_outs, b_outs[::-1]], axis=-1)
    return outputs, (f_H, b_H)


if __name__ == "__main__":
    key = jax.random.PRNGKey(0)
    T, B, D, H = 8, 4, 16, 32          # seq=8, batch=4, num_inputs=16, num_hiddens=32
    sigma = 0.01
    k1, k2, k3, k4, k5 = jax.random.split(key, 5)

    # Deterministic parameter init matching RNNScratch.__init__: randn * sigma, zero bias.
    params = {
        "W_xh_f": jax.random.normal(k1, (D, H), jnp.float32) * sigma,
        "W_hh_f": jax.random.normal(k2, (H, H), jnp.float32) * sigma,
        "b_h_f":  jnp.zeros((H,), jnp.float32),
        "W_xh_b": jax.random.normal(k3, (D, H), jnp.float32) * sigma,
        "W_hh_b": jax.random.normal(k4, (H, H), jnp.float32) * sigma,
        "b_h_b":  jnp.zeros((H,), jnp.float32),
    }
    inputs = jax.random.normal(k5, (T, B, D), jnp.float32)

    fwd = jax.jit(birnn_forward)
    outputs, (f_H, b_H) = fwd(inputs, params)
    jax.block_until_ready((outputs, f_H, b_H))

    ref_out, (ref_fH, ref_bH) = birnn_reference(inputs, params)
    # bf16 MXU operands with f32 accumulation: slightly looser atol than pure f32.
    np.testing.assert_allclose(np.asarray(outputs), np.asarray(ref_out), atol=3e-3, rtol=2e-2)
    np.testing.assert_allclose(np.asarray(f_H), np.asarray(ref_fH), atol=3e-3, rtol=2e-2)
    np.testing.assert_allclose(np.asarray(b_H), np.asarray(ref_bH), atol=3e-3, rtol=2e-2)

    print("KERNEL_OK")
</pallas_src>

<mosaic_0001>
module attributes {stable_mosaic.version = 11 : i64} {
  func.func @_birnn_kernel(%arg0: i32, %arg1: memref<64x16xbf16, #tpu.memory_space<vmem>>, %arg2: memref<16x64xbf16, #tpu.memory_space<vmem>>, %arg3: memref<64x64xbf16, #tpu.memory_space<vmem>>, %arg4: memref<1x64xf32, #tpu.memory_space<vmem>>, %arg5: memref<8x64xf32, #tpu.memory_space<vmem>>, %arg6: memref<64x64xf32, #tpu.memory_space<vmem>>, %arg7: memref<8x32xf32, #tpu.memory_space<vmem>>, %arg8: memref<8x32xf32, #tpu.memory_space<vmem>>, %arg9: memref<64x64xf32, #tpu.memory_space<vmem>>, %arg10: memref<64x64xf32, #tpu.memory_space<vmem>>) attributes {dimension_semantics = [#tpu.dimension_semantics<arbitrary>], iteration_bounds = array<i64: 1>, scalar_prefetch = 0 : i64, scratch_operands = 2 : i64, tpu.core_type = #tpu.core_type<tc>, window_params = [{pipeline_mode = #tpu.pipeline_mode<synchronous>, transform_indices = @transform_0, window_bounds = array<i64: 64, 16>}, {pipeline_mode = #tpu.pipeline_mode<synchronous>, transform_indices = @transform_1, window_bounds = array<i64: 16, 64>}, {pipeline_mode = #tpu.pipeline_mode<synchronous>, transform_indices = @transform_2, window_bounds = array<i64: 64, 64>}, {pipeline_mode = #tpu.pipeline_mode<synchronous>, transform_indices = @transform_3, window_bounds = array<i64: 1, 64>}, {pipeline_mode = #tpu.pipeline_mode<synchronous>, transform_indices = @transform_4, window_bounds = array<i64: 8, 64>}, {pipeline_mode = #tpu.pipeline_mode<synchronous>, transform_indices = @transform_5, window_bounds = array<i64: 64, 64>}, {pipeline_mode = #tpu.pipeline_mode<synchronous>, transform_indices = @transform_6, window_bounds = array<i64: 8, 32>}, {pipeline_mode = #tpu.pipeline_mode<synchronous>, transform_indices = @transform_7, window_bounds = array<i64: 8, 32>}]} {
    %c0 = arith.constant 0 : index
    %c0_0 = arith.constant 0 : index
    %0 = vector.load %arg1[%c0, %c0_0] : memref<64x16xbf16, #tpu.memory_space<vmem>>, vector<64x16xbf16>
    %c0_1 = arith.constant 0 : index
    %c0_2 = arith.constant 0 : index
    %1 = vector.load %arg2[%c0_1, %c0_2] : memref<16x64xbf16, #tpu.memory_space<vmem>>, vector<16x64xbf16>
    %cst = arith.constant dense<0.000000e+00> : vector<64x64xf32>
    %2 = tpu.matmul %0, %1, %cst {dimension_numbers = #tpu.dot_dimension_numbers<[1], [0], [0], [1], [0, 0, 1, 1], [], []>} : vector<64x16xbf16>, vector<16x64xbf16>, vector<64x64xf32> -> vector<64x64xf32>
    %c0_3 = arith.constant 0 : index
    %c0_4 = arith.constant 0 : index
    %3 = vector.load %arg4[%c0_3, %c0_4] : memref<1x64xf32, #tpu.memory_space<vmem>>, vector<1x64xf32>
    %4 = vector.broadcast %3 : vector<1x64xf32> to vector<64x64xf32>
    %5 = arith.addf %2, %4 : vector<64x64xf32>
    %6 = vector.extract_strided_slice %5 {offsets = [0, 0], sizes = [8, 32], strides = [1, 1]} : vector<64x64xf32> to vector<8x32xf32>
    %7 = vector.extract_strided_slice %5 {offsets = [56, 32], sizes = [8, 32], strides = [1, 1]} : vector<64x64xf32> to vector<8x32xf32>
    %8 = tpu.concatenate %6, %7 in 1 : vector<8x32xf32>, vector<8x32xf32> -> vector<8x64xf32>
    %c0_5 = arith.constant 0 : index
    %c0_6 = arith.constant 0 : index
    %9 = vector.load %arg9[%c0_5, %c0_6] : memref<64x64xf32, #tpu.memory_space<vmem>>, vector<8x64xf32>
    tpu.vector_store %arg9[%c0_5, %c0_6], %8 {strides = array<i32>} : memref<64x64xf32, #tpu.memory_space<vmem>>, vector<8x64xf32>,
    %10 = vector.extract_strided_slice %5 {offsets = [8, 0], sizes = [8, 32], strides = [1, 1]} : vector<64x64xf32> to vector<8x32xf32>
    %11 = vector.extract_strided_slice %5 {offsets = [48, 32], sizes = [8, 32], strides = [1, 1]} : vector<64x64xf32> to vector<8x32xf32>
    %12 = tpu.concatenate %10, %11 in 1 : vector<8x32xf32>, vector<8x32xf32> -> vector<8x64xf32>
    %c8 = arith.constant 8 : index
    %c0_7 = arith.constant 0 : index
    %13 = vector.load %arg9[%c8, %c0_7] : memref<64x64xf32, #tpu.memory_space<vmem>>, vector<8x64xf32>
    tpu.vector_store %arg9[%c8, %c0_7], %12 {strides = array<i32>} : memref<64x64xf32, #tpu.memory_space<vmem>>, vector<8x64xf32>,
    %14 = vector.extract_strided_slice %5 {offsets = [16, 0], sizes = [8, 32], strides = [1, 1]} : vector<64x64xf32> to vector<8x32xf32>
    %15 = vector.extract_strided_slice %5 {offsets = [40, 32], sizes = [8, 32], strides = [1, 1]} : vector<64x64xf32> to vector<8x32xf32>
    %16 = tpu.concatenate %14, %15 in 1 : vector<8x32xf32>, vector<8x32xf32> -> vector<8x64xf32>
    %c16 = arith.constant 16 : index
    %c0_8 = arith.constant 0 : index
    %17 = vector.load %arg9[%c16, %c0_8] : memref<64x64xf32, #tpu.memory_space<vmem>>, vector<8x64xf32>
    tpu.vector_store %arg9[%c16, %c0_8], %16 {strides = array<i32>} : memref<64x64xf32, #tpu.memory_space<vmem>>, vector<8x64xf32>,
    %18 = vector.extract_strided_slice %5 {offsets = [24, 0], sizes = [8, 32], strides = [1, 1]} : vector<64x64xf32> to vector<8x32xf32>
    %19 = vector.extract_strided_slice %5 {offsets = [32, 32], sizes = [8, 32], strides = [1, 1]} : vector<64x64xf32> to vector<8x32xf32>
    %20 = tpu.concatenate %18, %19 in 1 : vector<8x32xf32>, vector<8x32xf32> -> vector<8x64xf32>
    %c24 = arith.constant 24 : index
    %c0_9 = arith.constant 0 : index
    %21 = vector.load %arg9[%c24, %c0_9] : memref<64x64xf32, #tpu.memory_space<vmem>>, vector<8x64xf32>
    tpu.vector_store %arg9[%c24, %c0_9], %20 {strides = array<i32>} : memref<64x64xf32, #tpu.memory_space<vmem>>, vector<8x64xf32>,
    %22 = vector.extract_strided_slice %5 {offsets = [32, 0], sizes = [8, 32], strides = [1, 1]} : vector<64x64xf32> to vector<8x32xf32>
    %23 = vector.extract_strided_slice %5 {offsets = [24, 32], sizes = [8, 32], strides = [1, 1]} : vector<64x64xf32> to vector<8x32xf32>
    %24 = tpu.concatenate %22, %23 in 1 : vector<8x32xf32>, vector<8x32xf32> -> vector<8x64xf32>
    %c32 = arith.constant 32 : index
    %c0_10 = arith.constant 0 : index
    %25 = vector.load %arg9[%c32, %c0_10] : memref<64x64xf32, #tpu.memory_space<vmem>>, vector<8x64xf32>
    tpu.vector_store %arg9[%c32, %c0_10], %24 {strides = array<i32>} : memref<64x64xf32, #tpu.memory_space<vmem>>, vector<8x64xf32>,
    %26 = vector.extract_strided_slice %5 {offsets = [40, 0], sizes = [8, 32], strides = [1, 1]} : vector<64x64xf32> to vector<8x32xf32>
    %27 = vector.extract_strided_slice %5 {offsets = [16, 32], sizes = [8, 32], strides = [1, 1]} : vector<64x64xf32> to vector<8x32xf32>
    %28 = tpu.concatenate %26, %27 in 1 : vector<8x32xf32>, vector<8x32xf32> -> vector<8x64xf32>
    %c40 = arith.constant 40 : index
    %c0_11 = arith.constant 0 : index
    %29 = vector.load %arg9[%c40, %c0_11] : memref<64x64xf32, #tpu.memory_space<vmem>>, vector<8x64xf32>
    tpu.vector_store %arg9[%c40, %c0_11], %28 {strides = array<i32>} : memref<64x64xf32, #tpu.memory_space<vmem>>, vector<8x64xf32>,
    %30 = vector.extract_strided_slice %5 {offsets = [48, 0], sizes = [8, 32], strides = [1, 1]} : vector<64x64xf32> to vector<8x32xf32>
    %31 = vector.extract_strided_slice %5 {offsets = [8, 32], sizes = [8, 32], strides = [1, 1]} : vector<64x64xf32> to vector<8x32xf32>
    %32 = tpu.concatenate %30, %31 in 1 : vector<8x32xf32>, vector<8x32xf32> -> vector<8x64xf32>
    %c48 = arith.constant 48 : index
    %c0_12 = arith.constant 0 : index
    %33 = vector.load %arg9[%c48, %c0_12] : memref<64x64xf32, #tpu.memory_space<vmem>>, vector<8x64xf32>
    tpu.vector_store %arg9[%c48, %c0_12], %32 {strides = array<i32>} : memref<64x64xf32, #tpu.memory_space<vmem>>, vector<8x64xf32>,
    %34 = vector.extract_strided_slice %5 {offsets = [56, 0], sizes = [8, 32], strides = [1, 1]} : vector<64x64xf32> to vector<8x32xf32>
    %35 = vector.extract_strided_slice %5 {offsets = [0, 32], sizes = [8, 32], strides = [1, 1]} : vector<64x64xf32> to vector<8x32xf32>
    %36 = tpu.concatenate %34, %35 in 1 : vector<8x32xf32>, vector<8x32xf32> -> vector<8x64xf32>
    %c56 = arith.constant 56 : index
    %c0_13 = arith.constant 0 : index
    %37 = vector.load %arg9[%c56, %c0_13] : memref<64x64xf32, #tpu.memory_space<vmem>>, vector<8x64xf32>
    tpu.vector_store %arg9[%c56, %c0_13], %36 {strides = array<i32>} : memref<64x64xf32, #tpu.memory_space<vmem>>, vector<8x64xf32>,
    %c0_14 = arith.constant 0 : index
    %c0_15 = arith.constant 0 : index
    %38 = vector.load %arg3[%c0_14, %c0_15] : memref<64x64xbf16, #tpu.memory_space<vmem>>, vector<64x64xbf16>
    %c0_16 = arith.constant 0 : index
    %c0_17 = arith.constant 0 : index
    %39 = vector.load %arg5[%c0_16, %c0_17] : memref<8x64xf32, #tpu.memory_space<vmem>>, vector<8x64xf32>
    %c0_i32 = arith.constant 0 : i32
    %40 = arith.truncf %39 : vector<8x64xf32> to vector<8x64xbf16>
    %cst_18 = arith.constant dense<0.000000e+00> : vector<8x64xf32>
    %41 = tpu.matmul %40, %38, %cst_18 {dimension_numbers = #tpu.dot_dimension_numbers<[1], [0], [0], [1], [0, 0, 1, 1], [], []>} : vector<8x64xbf16>, vector<64x64xbf16>, vector<8x64xf32> -> vector<8x64xf32>
    %c8_i32 = arith.constant 8 : i32
    %42 = arith.muli %c0_i32, %c8_i32 : i32
    %43 = tpu.assume_multiple %42, 8 : i32
    %44 = arith.index_cast %43 : i32 to index
    %c0_19 = arith.constant 0 : index
    %45 = vector.load %arg9[%44, %c0_19] : memref<64x64xf32, #tpu.memory_space<vmem>>, vector<8x64xf32>
    %46 = arith.addf %41, %45 : vector<8x64xf32>
    %47 = math.tanh %46 : vector<8x64xf32>
    %48 = arith.index_cast %43 : i32 to index
    %c0_20 = arith.constant 0 : index
    %49 = vector.load %arg10[%48, %c0_20] : memref<64x64xf32, #tpu.memory_space<vmem>>, vector<8x64xf32>
    tpu.vector_store %arg10[%48, %c0_20], %47 {strides = array<i32>} : memref<64x64xf32, #tpu.memory_space<vmem>>, vector<8x64xf32>,
    %c1_i32 = arith.constant 1 : i32
    %50 = arith.truncf %47 : vector<8x64xf32> to vector<8x64xbf16>
    %cst_21 = arith.constant dense<0.000000e+00> : vector<8x64xf32>
    %51 = tpu.matmul %50, %38, %cst_21 {dimension_numbers = #tpu.dot_dimension_numbers<[1], [0], [0], [1], [0, 0, 1, 1], [], []>} : vector<8x64xbf16>, vector<64x64xbf16>, vector<8x64xf32> -> vector<8x64xf32>
    %c8_i32_22 = arith.constant 8 : i32
    %52 = arith.muli %c1_i32, %c8_i32_22 : i32
    %53 = tpu.assume_multiple %52, 8 : i32
    %54 = arith.index_cast %53 : i32 to index
    %c0_23 = arith.constant 0 : index
    %55 = vector.load %arg9[%54, %c0_23] : memref<64x64xf32, #tpu.memory_space<vmem>>, vector<8x64xf32>
    %56 = arith.addf %51, %55 : vector<8x64xf32>
    %57 = math.tanh %56 : vector<8x64xf32>
    %58 = arith.index_cast %53 : i32 to index
    %c0_24 = arith.constant 0 : index
    %59 = vector.load %arg10[%58, %c0_24] : memref<64x64xf32, #tpu.memory_space<vmem>>, vector<8x64xf32>
    tpu.vector_store %arg10[%58, %c0_24], %57 {strides = array<i32>} : memref<64x64xf32, #tpu.memory_space<vmem>>, vector<8x64xf32>,
    %c2_i32 = arith.constant 2 : i32
    %60 = arith.truncf %57 : vector<8x64xf32> to vector<8x64xbf16>
    %cst_25 = arith.constant dense<0.000000e+00> : vector<8x64xf32>
    %61 = tpu.matmul %60, %38, %cst_25 {dimension_numbers = #tpu.dot_dimension_numbers<[1], [0], [0], [1], [0, 0, 1, 1], [], []>} : vector<8x64xbf16>, vector<64x64xbf16>, vector<8x64xf32> -> vector<8x64xf32>
    %c8_i32_26 = arith.constant 8 : i32
    %62 = arith.muli %c2_i32, %c8_i32_26 : i32
    %63 = tpu.assume_multiple %62, 8 : i32
    %64 = arith.index_cast %63 : i32 to index
    %c0_27 = arith.constant 0 : index
    %65 = vector.load %arg9[%64, %c0_27] : memref<64x64xf32, #tpu.memory_space<vmem>>, vector<8x64xf32>
    %66 = arith.addf %61, %65 : vector<8x64xf32>
    %67 = math.tanh %66 : vector<8x64xf32>
    %68 = arith.index_cast %63 : i32 to index
    %c0_28 = arith.constant 0 : index
    %69 = vector.load %arg10[%68, %c0_28] : memref<64x64xf32, #tpu.memory_space<vmem>>, vector<8x64xf32>
    tpu.vector_store %arg10[%68, %c0_28], %67 {strides = array<i32>} : memref<64x64xf32, #tpu.memory_space<vmem>>, vector<8x64xf32>,
    %c3_i32 = arith.constant 3 : i32
    %70 = arith.truncf %67 : vector<8x64xf32> to vector<8x64xbf16>
    %cst_29 = arith.constant dense<0.000000e+00> : vector<8x64xf32>
    %71 = tpu.matmul %70, %38, %cst_29 {dimension_numbers = #tpu.dot_dimension_numbers<[1], [0], [0], [1], [0, 0, 1, 1], [], []>} : vector<8x64xbf16>, vector<64x64xbf16>, vector<8x64xf32> -> vector<8x64xf32>
    %c8_i32_30 = arith.constant 8 : i32
    %72 = arith.muli %c3_i32, %c8_i32_30 : i32
    %73 = tpu.assume_multiple %72, 8 : i32
    %74 = arith.index_cast %73 : i32 to index
    %c0_31 = arith.constant 0 : index
    %75 = vector.load %arg9[%74, %c0_31] : memref<64x64xf32, #tpu.memory_space<vmem>>, vector<8x64xf32>
    %76 = arith.addf %71, %75 : vector<8x64xf32>
    %77 = math.tanh %76 : vector<8x64xf32>
    %78 = arith.index_cast %73 : i32 to index
    %c0_32 = arith.constant 0 : index
    %79 = vector.load %arg10[%78, %c0_32] : memref<64x64xf32, #tpu.memory_space<vmem>>, vector<8x64xf32>
    tpu.vector_store %arg10[%78, %c0_32], %77 {strides = array<i32>} : memref<64x64xf32, #tpu.memory_space<vmem>>, vector<8x64xf32>,
    %c4_i32 = arith.constant 4 : i32
    %80 = arith.truncf %77 : vector<8x64xf32> to vector<8x64xbf16>
    %cst_33 = arith.constant dense<0.000000e+00> : vector<8x64xf32>
    %81 = tpu.matmul %80, %38, %cst_33 {dimension_numbers = #tpu.dot_dimension_numbers<[1], [0], [0], [1], [0, 0, 1, 1], [], []>} : vector<8x64xbf16>, vector<64x64xbf16>, vector<8x64xf32> -> vector<8x64xf32>
    %c8_i32_34 = arith.constant 8 : i32
    %82 = arith.muli %c4_i32, %c8_i32_34 : i32
    %83 = tpu.assume_multiple %82, 8 : i32
    %84 = arith.index_cast %83 : i32 to index
    %c0_35 = arith.constant 0 : index
    %85 = vector.load %arg9[%84, %c0_35] : memref<64x64xf32, #tpu.memory_space<vmem>>, vector<8x64xf32>
    %86 = arith.addf %81, %85 : vector<8x64xf32>
    %87 = math.tanh %86 : vector<8x64xf32>
    %88 = arith.index_cast %83 : i32 to index
    %c0_36 = arith.constant 0 : index
    %89 = vector.load %arg10[%88, %c0_36] : memref<64x64xf32, #tpu.memory_space<vmem>>, vector<8x64xf32>
    tpu.vector_store %arg10[%88, %c0_36], %87 {strides = array<i32>} : memref<64x64xf32, #tpu.memory_space<vmem>>, vector<8x64xf32>,
    %c5_i32 = arith.constant 5 : i32
    %90 = arith.truncf %87 : vector<8x64xf32> to vector<8x64xbf16>
    %cst_37 = arith.constant dense<0.000000e+00> : vector<8x64xf32>
    %91 = tpu.matmul %90, %38, %cst_37 {dimension_numbers = #tpu.dot_dimension_numbers<[1], [0], [0], [1], [0, 0, 1, 1], [], []>} : vector<8x64xbf16>, vector<64x64xbf16>, vector<8x64xf32> -> vector<8x64xf32>
    %c8_i32_38 = arith.constant 8 : i32
    %92 = arith.muli %c5_i32, %c8_i32_38 : i32
    %93 = tpu.assume_multiple %92, 8 : i32
    %94 = arith.index_cast %93 : i32 to index
    %c0_39 = arith.constant 0 : index
    %95 = vector.load %arg9[%94, %c0_39] : memref<64x64xf32, #tpu.memory_space<vmem>>, vector<8x64xf32>
    %96 = arith.addf %91, %95 : vector<8x64xf32>
    %97 = math.tanh %96 : vector<8x64xf32>
    %98 = arith.index_cast %93 : i32 to index
    %c0_40 = arith.constant 0 : index
    %99 = vector.load %arg10[%98, %c0_40] : memref<64x64xf32, #tpu.memory_space<vmem>>, vector<8x64xf32>
    tpu.vector_store %arg10[%98, %c0_40], %97 {strides = array<i32>} : memref<64x64xf32, #tpu.memory_space<vmem>>, vector<8x64xf32>,
    %c6_i32 = arith.constant 6 : i32
    %100 = arith.truncf %97 : vector<8x64xf32> to vector<8x64xbf16>
    %cst_41 = arith.constant dense<0.000000e+00> : vector<8x64xf32>
    %101 = tpu.matmul %100, %38, %cst_41 {dimension_numbers = #tpu.dot_dimension_numbers<[1], [0], [0], [1], [0, 0, 1, 1], [], []>} : vector<8x64xbf16>, vector<64x64xbf16>, vector<8x64xf32> -> vector<8x64xf32>
    %c8_i32_42 = arith.constant 8 : i32
    %102 = arith.muli %c6_i32, %c8_i32_42 : i32
    %103 = tpu.assume_multiple %102, 8 : i32
    %104 = arith.index_cast %103 : i32 to index
    %c0_43 = arith.constant 0 : index
    %105 = vector.load %arg9[%104, %c0_43] : memref<64x64xf32, #tpu.memory_space<vmem>>, vector<8x64xf32>
    %106 = arith.addf %101, %105 : vector<8x64xf32>
    %107 = math.tanh %106 : vector<8x64xf32>
    %108 = arith.index_cast %103 : i32 to index
    %c0_44 = arith.constant 0 : index
    %109 = vector.load %arg10[%108, %c0_44] : memref<64x64xf32, #tpu.memory_space<vmem>>, vector<8x64xf32>
    tpu.vector_store %arg10[%108, %c0_44], %107 {strides = array<i32>} : memref<64x64xf32, #tpu.memory_space<vmem>>, vector<8x64xf32>,
    %c7_i32 = arith.constant 7 : i32
    %110 = arith.truncf %107 : vector<8x64xf32> to vector<8x64xbf16>
    %cst_45 = arith.constant dense<0.000000e+00> : vector<8x64xf32>
    %111 = tpu.matmul %110, %38, %cst_45 {dimension_numbers = #tpu.dot_dimension_numbers<[1], [0], [0], [1], [0, 0, 1, 1], [], []>} : vector<8x64xbf16>, vector<64x64xbf16>, vector<8x64xf32> -> vector<8x64xf32>
    %c8_i32_46 = arith.constant 8 : i32
    %112 = arith.muli %c7_i32, %c8_i32_46 : i32
    %113 = tpu.assume_multiple %112, 8 : i32
    %114 = arith.index_cast %113 : i32 to index
    %c0_47 = arith.constant 0 : index
    %115 = vector.load %arg9[%114, %c0_47] : memref<64x64xf32, #tpu.memory_space<vmem>>, vector<8x64xf32>
    %116 = arith.addf %111, %115 : vector<8x64xf32>
    %117 = math.tanh %116 : vector<8x64xf32>
    %118 = arith.index_cast %113 : i32 to index
    %c0_48 = arith.constant 0 : index
    %119 = vector.load %arg10[%118, %c0_48] : memref<64x64xf32, #tpu.memory_space<vmem>>, vector<8x64xf32>
    tpu.vector_store %arg10[%118, %c0_48], %117 {strides = array<i32>} : memref<64x64xf32, #tpu.memory_space<vmem>>, vector<8x64xf32>,
    %c8_i32_49 = arith.constant 8 : i32
    %c0_50 = arith.constant 0 : index
    %c0_51 = arith.constant 0 : index
    %120 = vector.load %arg10[%c0_50, %c0_51] : memref<64x64xf32, #tpu.memory_space<vmem>>, vector<8x32xf32>
    %c56_52 = arith.constant 56 : index
    %c32_53 = arith.constant 32 : index
    %121 = vector.load %arg10[%c56_52, %c32_53] : memref<64x64xf32, #tpu.memory_space<vmem>>, vector<8x32xf32>
    %122 = tpu.concatenate %120, %121 in 1 : vector<8x32xf32>, vector<8x32xf32> -> vector<8x64xf32>
    %c0_54 = arith.constant 0 : index
    %c0_55 = arith.constant 0 : index
    %123 = vector.load %arg6[%c0_54, %c0_55] : memref<64x64xf32, #tpu.memory_space<vmem>>, vector<8x64xf32>
    tpu.vector_store %arg6[%c0_54, %c0_55], %122 {strides = array<i32>} : memref<64x64xf32, #tpu.memory_space<vmem>>, vector<8x64xf32>,
    %c8_56 = arith.constant 8 : index
    %c0_57 = arith.constant 0 : index
    %124 = vector.load %arg10[%c8_56, %c0_57] : memref<64x64xf32, #tpu.memory_space<vmem>>, vector<8x32xf32>
    %c48_58 = arith.constant 48 : index
    %c32_59 = arith.constant 32 : index
    %125 = vector.load %arg10[%c48_58, %c32_59] : memref<64x64xf32, #tpu.memory_space<vmem>>, vector<8x32xf32>
    %126 = tpu.concatenate %124, %125 in 1 : vector<8x32xf32>, vector<8x32xf32> -> vector<8x64xf32>
    %c8_60 = arith.constant 8 : index
    %c0_61 = arith.constant 0 : index
    %127 = vector.load %arg6[%c8_60, %c0_61] : memref<64x64xf32, #tpu.memory_space<vmem>>, vector<8x64xf32>
    tpu.vector_store %arg6[%c8_60, %c0_61], %126 {strides = array<i32>} : memref<64x64xf32, #tpu.memory_space<vmem>>, vector<8x64xf32>,
    %c16_62 = arith.constant 16 : index
    %c0_63 = arith.constant 0 : index
    %128 = vector.load %arg10[%c16_62, %c0_63] : memref<64x64xf32, #tpu.memory_space<vmem>>, vector<8x32xf32>
    %c40_64 = arith.constant 40 : index
    %c32_65 = arith.constant 32 : index
    %129 = vector.load %arg10[%c40_64, %c32_65] : memref<64x64xf32, #tpu.memory_space<vmem>>, vector<8x32xf32>
    %130 = tpu.concatenate %128, %129 in 1 : vector<8x32xf32>, vector<8x32xf32> -> vector<8x64xf32>
    %c16_66 = arith.constant 16 : index
    %c0_67 = arith.constant 0 : index
    %131 = vector.load %arg6[%c16_66, %c0_67] : memref<64x64xf32, #tpu.memory_space<vmem>>, vector<8x64xf32>
    tpu.vector_store %arg6[%c16_66, %c0_67], %130 {strides = array<i32>} : memref<64x64xf32, #tpu.memory_space<vmem>>, vector<8x64xf32>,
    %c24_68 = arith.constant 24 : index
    %c0_69 = arith.constant 0 : index
    %132 = vector.load %arg10[%c24_68, %c0_69] : memref<64x64xf32, #tpu.memory_space<vmem>>, vector<8x32xf32>
    %c32_70 = arith.constant 32 : index
    %c32_71 = arith.constant 32 : index
    %133 = vector.load %arg10[%c32_70, %c32_71] : memref<64x64xf32, #tpu.memory_space<vmem>>, vector<8x32xf32>
    %134 = tpu.concatenate %132, %133 in 1 : vector<8x32xf32>, vector<8x32xf32> -> vector<8x64xf32>
    %c24_72 = arith.constant 24 : index
    %c0_73 = arith.constant 0 : index
    %135 = vector.load %arg6[%c24_72, %c0_73] : memref<64x64xf32, #tpu.memory_space<vmem>>, vector<8x64xf32>
    tpu.vector_store %arg6[%c24_72, %c0_73], %134 {strides = array<i32>} : memref<64x64xf32, #tpu.memory_space<vmem>>, vector<8x64xf32>,
    %c32_74 = arith.constant 32 : index
    %c0_75 = arith.constant 0 : index
    %136 = vector.load %arg10[%c32_74, %c0_75] : memref<64x64xf32, #tpu.memory_space<vmem>>, vector<8x32xf32>
    %c24_76 = arith.constant 24 : index
    %c32_77 = arith.constant 32 : index
    %137 = vector.load %arg10[%c24_76, %c32_77] : memref<64x64xf32, #tpu.memory_space<vmem>>, vector<8x32xf32>
    %138 = tpu.concatenate %136, %137 in 1 : vector<8x32xf32>, vector<8x32xf32> -> vector<8x64xf32>
    %c32_78 = arith.constant 32 : index
    %c0_79 = arith.constant 0 : index
    %139 = vector.load %arg6[%c32_78, %c0_79] : memref<64x64xf32, #tpu.memory_space<vmem>>, vector<8x64xf32>
    tpu.vector_store %arg6[%c32_78, %c0_79], %138 {strides = array<i32>} : memref<64x64xf32, #tpu.memory_space<vmem>>, vector<8x64xf32>,
    %c40_80 = arith.constant 40 : index
    %c0_81 = arith.constant 0 : index
    %140 = vector.load %arg10[%c40_80, %c0_81] : memref<64x64xf32, #tpu.memory_space<vmem>>, vector<8x32xf32>
    %c16_82 = arith.constant 16 : index
    %c32_83 = arith.constant 32 : index
    %141 = vector.load %arg10[%c16_82, %c32_83] : memref<64x64xf32, #tpu.memory_space<vmem>>, vector<8x32xf32>
    %142 = tpu.concatenate %140, %141 in 1 : vector<8x32xf32>, vector<8x32xf32> -> vector<8x64xf32>
    %c40_84 = arith.constant 40 : index
    %c0_85 = arith.constant 0 : index
    %143 = vector.load %arg6[%c40_84, %c0_85] : memref<64x64xf32, #tpu.memory_space<vmem>>, vector<8x64xf32>
    tpu.vector_store %arg6[%c40_84, %c0_85], %142 {strides = array<i32>} : memref<64x64xf32, #tpu.memory_space<vmem>>, vector<8x64xf32>,
    %c48_86 = arith.constant 48 : index
    %c0_87 = arith.constant 0 : index
    %144 = vector.load %arg10[%c48_86, %c0_87] : memref<64x64xf32, #tpu.memory_space<vmem>>, vector<8x32xf32>
    %c8_88 = arith.constant 8 : index
    %c32_89 = arith.constant 32 : index
    %145 = vector.load %arg10[%c8_88, %c32_89] : memref<64x64xf32, #tpu.memory_space<vmem>>, vector<8x32xf32>
    %146 = tpu.concatenate %144, %145 in 1 : vector<8x32xf32>, vector<8x32xf32> -> vector<8x64xf32>
    %c48_90 = arith.constant 48 : index
    %c0_91 = arith.constant 0 : index
    %147 = vector.load %arg6[%c48_90, %c0_91] : memref<64x64xf32, #tpu.memory_space<vmem>>, vector<8x64xf32>
    tpu.vector_store %arg6[%c48_90, %c0_91], %146 {strides = array<i32>} : memref<64x64xf32, #tpu.memory_space<vmem>>, vector<8x64xf32>,
    %c56_92 = arith.constant 56 : index
    %c0_93 = arith.constant 0 : index
    %148 = vector.load %arg10[%c56_92, %c0_93] : memref<64x64xf32, #tpu.memory_space<vmem>>, vector<8x32xf32>
    %c0_94 = arith.constant 0 : index
    %c32_95 = arith.constant 32 : index
    %149 = vector.load %arg10[%c0_94, %c32_95] : memref<64x64xf32, #tpu.memory_space<vmem>>, vector<8x32xf32>
    %150 = tpu.concatenate %148, %149 in 1 : vector<8x32xf32>, vector<8x32xf32> -> vector<8x64xf32>
    %c56_96 = arith.constant 56 : index
    %c0_97 = arith.constant 0 : index
    %151 = vector.load %arg6[%c56_96, %c0_97] : memref<64x64xf32, #tpu.memory_space<vmem>>, vector<8x64xf32>
    tpu.vector_store %arg6[%c56_96, %c0_97], %150 {strides = array<i32>} : memref<64x64xf32, #tpu.memory_space<vmem>>, vector<8x64xf32>,
    %152 = vector.extract_strided_slice %117 {offsets = [0, 0], sizes = [8, 32], strides = [1, 1]} : vector<8x64xf32> to vector<8x32xf32>
    %c0_98 = arith.constant 0 : index
    %c0_99 = arith.constant 0 : index
    %153 = vector.load %arg7[%c0_98, %c0_99] : memref<8x32xf32, #tpu.memory_space<vmem>>, vector<8x32xf32>
    tpu.vector_store %arg7[%c0_98, %c0_99], %152 {strides = array<i32>} : memref<8x32xf32, #tpu.memory_space<vmem>>, vector<8x32xf32>,
    %154 = vector.extract_strided_slice %117 {offsets = [0, 32], sizes = [8, 32], strides = [1, 1]} : vector<8x64xf32> to vector<8x32xf32>
    %c0_100 = arith.constant 0 : index
    %c0_101 = arith.constant 0 : index
    %155 = vector.load %arg8[%c0_100, %c0_101] : memref<8x32xf32, #tpu.memory_space<vmem>>, vector<8x32xf32>
    tpu.vector_store %arg8[%c0_100, %c0_101], %154 {strides = array<i32>} : memref<8x32xf32, #tpu.memory_space<vmem>>, vector<8x32xf32>,
    return
  }
  func.func @transform_0(%arg0: i32) -> (i32, i32) {
    %c0_i32 = arith.constant 0 : i32
    %c0_i32_0 = arith.constant 0 : i32
    %c0_i32_1 = arith.constant 0 : i32
    return %c0_i32, %c0_i32_0 : i32, i32
  }
  func.func @transform_1(%arg0: i32) -> (i32, i32) {
    %c0_i32 = arith.constant 0 : i32
    %c0_i32_0 = arith.constant 0 : i32
    %c0_i32_1 = arith.constant 0 : i32
    return %c0_i32, %c0_i32_0 : i32, i32
  }
  func.func @transform_2(%arg0: i32) -> (i32, i32) {
    %c0_i32 = arith.constant 0 : i32
    %c0_i32_0 = arith.constant 0 : i32
    %c0_i32_1 = arith.constant 0 : i32
    return %c0_i32, %c0_i32_0 : i32, i32
  }
  func.func @transform_3(%arg0: i32) -> (i32, i32) {
    %c0_i32 = arith.constant 0 : i32
    %c0_i32_0 = arith.constant 0 : i32
    %c0_i32_1 = arith.constant 0 : i32
    return %c0_i32, %c0_i32_0 : i32, i32
  }
  func.func @transform_4(%arg0: i32) -> (i32, i32) {
    %c0_i32 = arith.constant 0 : i32
    %c0_i32_0 = arith.constant 0 : i32
    %c0_i32_1 = arith.constant 0 : i32
    return %c0_i32, %c0_i32_0 : i32, i32
  }
  func.func @transform_5(%arg0: i32) -> (i32, i32) {
    %c0_i32 = arith.constant 0 : i32
    %c0_i32_0 = arith.constant 0 : i32
    %c0_i32_1 = arith.constant 0 : i32
    return %c0_i32, %c0_i32_0 : i32, i32
  }
  func.func @transform_6(%arg0: i32) -> (i32, i32) {
    %c0_i32 = arith.constant 0 : i32
    %c0_i32_0 = arith.constant 0 : i32
    %c0_i32_1 = arith.constant 0 : i32
    return %c0_i32, %c0_i32_0 : i32, i32
  }
  func.func @transform_7(%arg0: i32) -> (i32, i32) {
    %c0_i32 = arith.constant 0 : i32
    %c0_i32_0 = arith.constant 0 : i32
    %c0_i32_1 = arith.constant 0 : i32
    return %c0_i32, %c0_i32_0 : i32, i32
  }
}

</mosaic_0001>

<bundles_post_ra>
// kernel: birnn_forward.1
= control target key start
LH: loop header
LB: loop body
LE: loop exit
PB: predicated region body
PF: predicated region fallthrough
CT: control target
= control target key end

     0   :  { %vm67_vm0 = vcmask 130048   ;;  %v837_v1 = vmov 0.0   ;;  %vm838_vm1 = vmmov 0   ;;  %vm147_vm2 = vcmask 523264   ;;  %s839_s8 = smov 96   ;;  %s1085_s1 = inlined_call_operand.vmem [shape: bf16[16,64], index: 1, kind: input, shape index: {}]   ;;  %s1086_s0 = inlined_call_operand.vmem [shape: bf16[64,16], index: 0, kind: input, shape index: {}]   ;;  %s1087_s2 = inlined_call_operand.vmem [shape: bf16[64,64], index: 2, kind: input, shape index: {}]   ;;  %s1088_s4 = inlined_call_operand.vmem [shape: f32[8,64], index: 4, kind: input, shape index: {}]   ;;  %s1089_s3 = inlined_call_operand.vmem [shape: f32[1,64], index: 3, kind: input, shape index: {}]   ;;  %s1090_s5 = inlined_call_operand.vmem [shape: f32[64,64], index: 5, kind: output, shape index: {0}]   ;;  %s1091_s6 = inlined_call_operand.vmem [shape: f32[8,32], index: 6, kind: output, shape index: {1}]   ;;  %s1092_s7 = inlined_call_operand.vmem [shape: f32[8,32], index: 7, kind: output, shape index: {2}]  }
   0x1   :  { %v812_v0 = vld [vmem:[%s1085_s1] sm:$0xff]   ;;  %713 = vmatprep.subr.bf16.mxu1 %v837_v1  ;;  %721 = vmatprep.mubr.msk.bf16.mxu1 %vm838_vm1, %v837_v1  ;;  %v814_v3 = vld [vmem:[%s1086_s0 + $0x8] sm:$0xff]   ;;  %v816_v5 = vld [vmem:[%s1086_s0 + $0x10] sm:$0xff]   ;;  %vm145_vm3 = vcmask 261120  }
   0x2   :  { %v813_v2 = vld [vmem:[%s1086_s0] sm:$0xff]   ;;  %703 = vmatprep.subr.bf16.mxu0 %v812_v0  ;;  %v906_v6 = vld [vmem:[%s1087_s2 + $0x8] sm:$0xff]   ;;  %v917_v7 = vld [vmem:[%s1087_s2 + $0x10] sm:$0xff]  }
   0x3   :  { %704 = vmatpush3.bf16.msra.mxu0 %v812_v0  ;;  %705 = vmatprep.mubr.msk.bf16.mxu0 %vm67_vm0, %v813_v2  ;;  %v896_v4 = vld [vmem:[%s1087_s2] sm:$0xff]   ;;  %v818_v8 = vld [vmem:[%s1086_s0 + $0x18] sm:$0xff]  }
   0x4   :  { %725 = vmatprep.subr.bf16.mxu0 %v837_v1  ;;  %714 = vmatpush3.bf16.msra.mxu1 %v896_v4  ;;  %v929_v9 = vld [vmem:[%s1087_s2 + $0x18] sm:$0xff]   ;;  %v171_v10 = vld [vmem:[%s1088_s4] sm:$0xff] }
   0x5   :  { %715 = vmatprep.subr.bf16.mxu1 %v837_v1  ;;  %v172_v11 = vpack.c.bf16 %v171_v10, %v171_v10  ;;  %v636_v16 = vld [vmem:[%s1089_s3] ss:$0 sm:$0xff] }
   0x6   :  { %706 = vmatmul.mubr.msk.bf16.vlgmr.msra.gmra.mrb[0].mxu0 %vm67_vm0, %v814_v3 }
   0x7   :  { %709 = vmatprep.mubr.msk.bf16.mxu0 %vm67_vm0, %v816_v5  ;;  %726 = vmatpush3.bf16.msra.mxu0 %v896_v4 }
   0x8   :  { %727 = vmatprep.subr.bf16.mxu0 %v837_v1  ;;  %716 = vmatpush3.bf16.msra.mxu1 %v906_v6 }
   0x9   :  { %717 = vmatprep.subr.bf16.mxu1 %v837_v1 }
   0xb   :  { %728 = vmatpush3.bf16.msra.mxu0 %v906_v6 }
   0xc   :  { %729 = vmatprep.subr.bf16.mxu0 %v837_v1  ;;  %718 = vmatpush3.bf16.msra.mxu1 %v917_v7 }
   0xd   :  { %719 = vmatprep.subr.bf16.mxu1 %v837_v1 }
   0xe   :  { %710 = vmatmul.mubr.msk.bf16.gmra.mrb[4].mxu0 %vm67_vm0, %v818_v8 }
   0xf   :  { %730 = vmatpush3.bf16.msra.mxu0 %v917_v7  ;;  %733 = vmatprep.mubr.msk.bf16.mxu0 %vm838_vm1, %v837_v1 }
  0x10   :  { %731 = vmatprep.subr.bf16.mxu0 %v837_v1  ;;  %720 = vmatpush3.bf16.msra.mxu1 %v929_v9 }
  0x11   :  { %737 = vmatprep.subr.bf16.mxu1 %v837_v1 }
  0x13   :  { %732 = vmatpush3.bf16.msra.mxu0 %v929_v9  ;;  %722 = vmatmul.mubr.msk.bf16.vlgmr.msra.gmra.mrb[0].mxu1 %vm147_vm2, %v172_v11 }
  0x14   :  { %749 = vmatprep.subr.bf16.mxu0 %v837_v1  ;;  %738 = vmatpush3.bf16.msra.mxu1 %v896_v4 }
  0x15   :  { %745 = vmatprep.mubr.msk.bf16.mxu1 %vm838_vm1, %v837_v1  ;;  %739 = vmatprep.subr.bf16.mxu1 %v837_v1 }
  0x18   :  { %740 = vmatpush3.bf16.msra.mxu1 %v906_v6 }
  0x19   :  { %741 = vmatprep.subr.bf16.mxu1 %v837_v1 }
  0x1c   :  { %742 = vmatpush3.bf16.msra.mxu1 %v917_v7 }
  0x1d   :  { %743 = vmatprep.subr.bf16.mxu1 %v837_v1 }
  0x20   :  { %744 = vmatpush3.bf16.msra.mxu1 %v929_v9 }
  0x21   :  { %761 = vmatprep.subr.bf16.mxu1 %v837_v1 }
  0xd9   :  { %v707_v12 = vpop.f32.mrb[0].mxu0 }
  0xda   :  { %v114_v13 = vpop.f32.mrb[1].mxu0  ;;  %v123_v29 = vadd.f32 %v707_v12, %v636_v16 }
  0xdb   :  { %v708_v14 = vpop.f32.mrb[2].mxu0  ;;  %v115_v24 = vadd.f32 %v636_v16, %v114_v13 }
  0xdc   :  { %v117_v15 = vpop.f32.mrb[3].mxu0  ;;  %v126_v21 = vadd.f32 %v708_v14, %v636_v16 }
  0xdd   :  { %v118_v18 = vadd.f32 %v636_v16, %v117_v15 }
  0xe1   :  { %v711_v17 = vpop.f32.mrb[4].mxu0 }
  0xe2   :  { %v139_v19 = vadd.f32 %v711_v17, %v636_v16  ;;  %v130_v20 = vpop.f32.mrb[5].mxu0 }
  0xe3   :  { %v131_v22 = vadd.f32 %v636_v16, %v130_v20  ;;  %v712_v23 = vpop.f32.mrb[6].mxu0 }
  0xe4   :  { %v149_v25 = vsel %vm145_vm3, %v118_v18, %v139_v19  ;;  %v159_v26 = vsel %vm145_vm3, %v139_v19, %v118_v18  ;;  %v142_v27 = vadd.f32 %v712_v23, %v636_v16  ;;  %v133_v28 = vpop.f32.mrb[7].mxu0 }
  0xe5   :  { %150 = vst.msk [vmem:[#allocation2 + $0x8] sm:$0xff] %vm147_vm2, %v149_v25  ;;  %160 = vst.msk [vmem:[#allocation2 + $0x30] sm:$0xff] %vm147_vm2, %v159_v26  ;;  %v153_v30 = vsel %vm145_vm3, %v126_v21, %v131_v22  ;;  %v155_v31 = vsel %vm145_vm3, %v131_v22, %v126_v21  ;;  %v134_v32 = vadd.f32 %v636_v16, %v133_v28 }
  0xe6   :  { %154 = vst.msk [vmem:[#allocation2 + $0x18] sm:$0xff] %vm147_vm2, %v153_v30  ;;  %156 = vst.msk [vmem:[#allocation2 + $0x20] sm:$0xff] %vm147_vm2, %v155_v31  ;;  %v146_v33 = vsel %vm145_vm3, %v115_v24, %v142_v27  ;;  %v161_v34 = vsel %vm145_vm3, %v142_v27, %v115_v24  ;;  %v235_v37 = vpop.f32.mrb[0].mxu1 }
  0xe7   :  { %148 = vst.msk [vmem:[#allocation2] sm:$0xff] %vm147_vm2, %v146_v33  ;;  %162 = vst.msk [vmem:[#allocation2 + $0x38] sm:$0xff] %vm147_vm2, %v161_v34  ;;  %v151_v35 = vsel %vm145_vm3, %v123_v29, %v134_v32  ;;  %v157_v36 = vsel %vm145_vm3, %v134_v32, %v123_v29  ;;  %v723_v38 = vpop.f32.mrb[1].mxu1 }
  0xe8   :  { %152 = vst.msk [vmem:[#allocation2 + $0x10] sm:$0xff] %vm147_vm2, %v151_v35  ;;  %158 = vst.msk [vmem:[#allocation2 + $0x28] sm:$0xff] %vm147_vm2, %v157_v36  ;;  %v238_v39 = vpop.f32.mrb[2].mxu1 }
  0xe9   :  { %v724_v40 = vpop.f32.mrb[3].mxu1 }
  0xec   :  { %v245_v45 = vld [vmem:[#allocation2 + $0x8] sm:$0xff] }
  0xed   :  { %v343_v61 = vld [vmem:[#allocation2 + $0x18] sm:$0xff]  ;;  %v392_v10 = vld [vmem:[#allocation2 + $0x20] sm:$0xff] }
  0xee   :  { %v173_v41 = vld [vmem:[#allocation2] sm:$0xff] }
  0xef   :  { %v236_v42 = vadd.f32 %v235_v37, %v173_v41  ;;  %v294_v53 = vld [vmem:[#allocation2 + $0x10] sm:$0xff]  ;;  %v539_v41 = vld [vmem:[#allocation2 + $0x38] sm:$0xff] }
  0xf1   :  { %821 = vtanh.f32 %v236_v42 }
  0xfb   :  { %v822_v43 = vpop.eup %821 }
  0xfc   :  { %242 = vst.msk [vmem:[#allocation3] sm:$0xff] %vm147_vm2, %v822_v43  ;;  %v243_v44 = vpack.c.bf16 %v822_v43, %v822_v43 }
  0xfe   :  { %734 = vmatmul.mubr.msk.bf16.vlgmr.msra.gmra.mrb[8].mxu0 %vm147_vm2, %v243_v44 }
  0xff   :  { %750 = vmatpush3.bf16.msra.mxu0 %v896_v4  ;;  %757 = vmatprep.mubr.msk.bf16.mxu0 %vm838_vm1, %v837_v1 }
 0x100   :  { %751 = vmatprep.subr.bf16.mxu0 %v837_v1 }
 0x103   :  { %752 = vmatpush3.bf16.msra.mxu0 %v906_v6 }
 0x104   :  { %753 = vmatprep.subr.bf16.mxu0 %v837_v1 }
 0x107   :  { %754 = vmatpush3.bf16.msra.mxu0 %v917_v7 }
 0x108   :  { %755 = vmatprep.subr.bf16.mxu0 %v837_v1 }
 0x10b   :  { %756 = vmatpush3.bf16.msra.mxu0 %v929_v9 }
 0x10c   :  { %773 = vmatprep.subr.bf16.mxu0 %v837_v1 }
 0x1d1   :  { %v283_v46 = vpop.f32.mrb[8].mxu0 }
 0x1d2   :  { %v284_v47 = vadd.f32 %v283_v46, %v245_v45  ;;  %v735_v48 = vpop.f32.mrb[9].mxu0 }
 0x1d3   :  { %v286_v49 = vpop.f32.mrb[10].mxu0  ;;  %v586_v48 = vld [vmem:[#allocation3] sm:$0xff] }
 0x1d4   :  { %823 = vtanh.f32 %v284_v47  ;;  %v736_v50 = vpop.f32.mrb[11].mxu0 }
 0x1de   :  { %v824_v51 = vpop.eup %823 }
 0x1df   :  { %291 = vst.msk [vmem:[#allocation3 + $0x8] sm:$0xff] %vm147_vm2, %v824_v51  ;;  %v292_v52 = vpack.c.bf16 %v824_v51, %v824_v51 }
 0x1e1   :  { %746 = vmatmul.mubr.msk.bf16.vlgmr.msra.gmra.mrb[4].mxu1 %vm147_vm2, %v292_v52 }
 0x1e2   :  { %762 = vmatpush3.bf16.msra.mxu1 %v896_v4  ;;  %769 = vmatprep.mubr.msk.bf16.mxu1 %vm838_vm1, %v837_v1 }
 0x1e3   :  { %763 = vmatprep.subr.bf16.mxu1 %v837_v1 }
 0x1e6   :  { %764 = vmatpush3.bf16.msra.mxu1 %v906_v6  ;;  %v590_v37 = vld [vmem:[#allocation3 + $0x8] sm:$0xff] }
 0x1e7   :  { %765 = vmatprep.subr.bf16.mxu1 %v837_v1 }
 0x1ea   :  { %766 = vmatpush3.bf16.msra.mxu1 %v917_v7 }
 0x1eb   :  { %767 = vmatprep.subr.bf16.mxu1 %v837_v1 }
 0x1ee   :  { %768 = vmatpush3.bf16.msra.mxu1 %v929_v9 }
 0x1ef   :  { %785 = vmatprep.subr.bf16.mxu1 %v837_v1 }
 0x2b4   :  { %v332_v54 = vpop.f32.mrb[4].mxu1 }
 0x2b5   :  { %v333_v55 = vadd.f32 %v332_v54, %v294_v53  ;;  %v747_v56 = vpop.f32.mrb[5].mxu1 }
 0x2b6   :  { %v335_v57 = vpop.f32.mrb[6].mxu1 }
 0x2b7   :  { %825 = vtanh.f32 %v333_v55  ;;  %v748_v58 = vpop.f32.mrb[7].mxu1 }
 0x2c1   :  { %v826_v59 = vpop.eup %825 }
 0x2c2   :  { %340 = vst.msk [vmem:[#allocation3 + $0x10] sm:$0xff] %vm147_vm2, %v826_v59  ;;  %v341_v60 = vpack.c.bf16 %v826_v59, %v826_v59 }
 0x2c4   :  { %758 = vmatmul.mubr.msk.bf16.vlgmr.msra.gmra.mrb[12].mxu0 %vm147_vm2, %v341_v60 }
 0x2c5   :  { %774 = vmatpush3.bf16.msra.mxu0 %v896_v4  ;;  %781 = vmatprep.mubr.msk.bf16.mxu0 %vm838_vm1, %v837_v1 }
 0x2c6   :  { %775 = vmatprep.subr.bf16.mxu0 %v837_v1 }
 0x2c9   :  { %776 = vmatpush3.bf16.msra.mxu0 %v906_v6  ;;  %v594_v28 = vld [vmem:[#allocation3 + $0x10] sm:$0xff] }
 0x2ca   :  { %777 = vmatprep.subr.bf16.mxu0 %v837_v1 }
 0x2cd   :  { %778 = vmatpush3.bf16.msra.mxu0 %v917_v7 }
 0x2ce   :  { %779 = vmatprep.subr.bf16.mxu0 %v837_v1 }
 0x2d1   :  { %780 = vmatpush3.bf16.msra.mxu0 %v929_v9 }
 0x2d2   :  { %797 = vmatprep.subr.bf16.mxu0 %v837_v1 }
 0x397   :  { %v381_v62 = vpop.f32.mrb[12].mxu0 }
 0x398   :  { %v382_v63 = vadd.f32 %v381_v62, %v343_v61  ;;  %v759_v0 = vpop.f32.mrb[13].mxu0 }
 0x399   :  { %v384_v2 = vpop.f32.mrb[14].mxu0 }
 0x39a   :  { %827 = vtanh.f32 %v382_v63  ;;  %v760_v3 = vpop.f32.mrb[15].mxu0 }
 0x3a4   :  { %v828_v5 = vpop.eup %827 }
 0x3a5   :  { %389 = vst.msk [vmem:[#allocation3 + $0x18] sm:$0xff] %vm147_vm2, %v828_v5  ;;  %v390_v8 = vpack.c.bf16 %v828_v5, %v828_v5 }
 0x3a7   :  { %770 = vmatmul.mubr.msk.bf16.vlgmr.msra.gmra.mrb[8].mxu1 %vm147_vm2, %v390_v8 }
 0x3a8   :  { %786 = vmatpush3.bf16.msra.mxu1 %v896_v4  ;;  %793 = vmatprep.mubr.msk.bf16.mxu1 %vm838_vm1, %v837_v1 }
 0x3a9   :  { %787 = vmatprep.subr.bf16.mxu1 %v837_v1 }
 0x3ac   :  { %788 = vmatpush3.bf16.msra.mxu1 %v906_v6  ;;  %v598_v18 = vld [vmem:[#allocation3 + $0x18] sm:$0xff] }
 0x3ad   :  { %789 = vmatprep.subr.bf16.mxu1 %v837_v1 }
 0x3b0   :  { %790 = vmatpush3.bf16.msra.mxu1 %v917_v7 }
 0x3b1   :  { %791 = vmatprep.subr.bf16.mxu1 %v837_v1 }
 0x3b4   :  { %792 = vmatpush3.bf16.msra.mxu1 %v929_v9 }
 0x47a   :  { %v430_v11 = vpop.f32.mrb[8].mxu1 }
 0x47b   :  { %v431_v12 = vadd.f32 %v430_v11, %v392_v10  ;;  %v771_v13 = vpop.f32.mrb[9].mxu1 }
 0x47c   :  { %v433_v14 = vpop.f32.mrb[10].mxu1 }
 0x47d   :  { %829 = vtanh.f32 %v431_v12  ;;  %v772_v15 = vpop.f32.mrb[11].mxu1 }
 0x487   :  { %v830_v16 = vpop.eup %829 }
 0x488   :  { %438 = vst.msk [vmem:[#allocation3 + $0x20] sm:$0xff] %vm147_vm2, %v830_v16  ;;  %v439_v17 = vpack.c.bf16 %v830_v16, %v830_v16 }
 0x48a   :  { %782 = vmatmul.mubr.msk.bf16.vlgmr.msra.gmra.mrb[16].mxu0 %vm147_vm2, %v439_v17 }
 0x48b   :  { %798 = vmatpush3.bf16.msra.mxu0 %v896_v4  ;;  %805 = vmatprep.mubr.msk.bf16.mxu0 %vm838_vm1, %v837_v1  ;;  %v441_v4 = vld [vmem:[#allocation2 + $0x28] sm:$0xff] }
 0x48c   :  { %799 = vmatprep.subr.bf16.mxu0 %v837_v1 }
 0x48f   :  { %v599_v19 = vld [vmem:[#allocation3 + $0x20] sm:$0xff]  ;;  %800 = vmatpush3.bf16.msra.mxu0 %v906_v6 }
 0x490   :  { %v600_v20 = vsel %vm145_vm3, %v598_v18, %v599_v19  ;;  %v604_v21 = vsel %vm145_vm3, %v599_v19, %v598_v18  ;;  %801 = vmatprep.subr.bf16.mxu0 %v837_v1 }
 0x491   :  { %601 = vst.msk [vmem:[%s1090_s5 + $0x18] sm:$0xff] %vm147_vm2, %v600_v20  ;;  %605 = vst.msk [vmem:[%s1090_s5 + $0x20] sm:$0xff] %vm147_vm2, %v604_v21 }
 0x493   :  { %802 = vmatpush3.bf16.msra.mxu0 %v917_v7 }
 0x494   :  { %803 = vmatprep.subr.bf16.mxu0 %v837_v1 }
 0x497   :  { %804 = vmatpush3.bf16.msra.mxu0 %v929_v9  ;;  %v490_v9 = vld [vmem:[#allocation2 + $0x30] sm:$0xff] }
 0x55d   :  { %v479_v6 = vpop.f32.mrb[16].mxu0 }
 0x55e   :  { %v480_v22 = vadd.f32 %v479_v6, %v441_v4  ;;  %v783_v23 = vpop.f32.mrb[17].mxu0 }
 0x55f   :  { %v482_v24 = vpop.f32.mrb[18].mxu0 }
 0x560   :  { %831 = vtanh.f32 %v480_v22  ;;  %v784_v25 = vpop.f32.mrb[19].mxu0 }
 0x56a   :  { %v832_v26 = vpop.eup %831 }
 0x56b   :  { %487 = vst.msk [vmem:[#allocation3 + $0x28] sm:$0xff] %vm147_vm2, %v832_v26  ;;  %v488_v27 = vpack.c.bf16 %v832_v26, %v832_v26 }
 0x56d   :  { %794 = vmatmul.mubr.msk.bf16.vlgmr.msra.gmra.mrb[12].mxu1 %vm147_vm2, %v488_v27 }
 0x572   :  { %v595_v29 = vld [vmem:[#allocation3 + $0x28] sm:$0xff] }
 0x573   :  { %v596_v7 = vsel %vm145_vm3, %v594_v28, %v595_v29  ;;  %v608_v1 = vsel %vm145_vm3, %v595_v29, %v594_v28 }
 0x574   :  { %597 = vst.msk [vmem:[%s1090_s5 + $0x10] sm:$0xff] %vm147_vm2, %v596_v7  ;;  %609 = vst.msk [vmem:[%s1090_s5 + $0x28] sm:$0xff] %vm147_vm2, %v608_v1 }
 0x640   :  { %v528_v30 = vpop.f32.mrb[12].mxu1 }
 0x641   :  { %v529_v31 = vadd.f32 %v528_v30, %v490_v9  ;;  %v795_v32 = vpop.f32.mrb[13].mxu1 }
 0x642   :  { %v531_v33 = vpop.f32.mrb[14].mxu1 }
 0x643   :  { %833 = vtanh.f32 %v529_v31  ;;  %v796_v34 = vpop.f32.mrb[15].mxu1 }
 0x64d   :  { %v834_v35 = vpop.eup %833 }
 0x64e   :  { %536 = vst.msk [vmem:[#allocation3 + $0x30] sm:$0xff] %vm147_vm2, %v834_v35  ;;  %v537_v36 = vpack.c.bf16 %v834_v35, %v834_v35 }
 0x650   :  { %806 = vmatmul.mubr.msk.bf16.vlgmr.msra.gmra.mrb[20].mxu0 %vm147_vm2, %v537_v36 }
 0x655   :  { %v591_v38 = vld [vmem:[#allocation3 + $0x30] sm:$0xff] }
 0x656   :  { %v592_v39 = vsel %vm145_vm3, %v590_v37, %v591_v38  ;;  %v612_v40 = vsel %vm145_vm3, %v591_v38, %v590_v37 }
 0x657   :  { %593 = vst.msk [vmem:[%s1090_s5 + $0x8] sm:$0xff] %vm147_vm2, %v592_v39  ;;  %613 = vst.msk [vmem:[%s1090_s5 + $0x30] sm:$0xff] %vm147_vm2, %v612_v40 }
 0x723   :  { %v577_v42 = vpop.f32.mrb[20].mxu0 }
 0x724   :  { %v578_v43 = vadd.f32 %v577_v42, %v539_v41  ;;  %v807_v44 = vpop.f32.mrb[21].mxu0 }
 0x725   :  { %v580_v45 = vpop.f32.mrb[22].mxu0 }
 0x726   :  { %835 = vtanh.f32 %v578_v43  ;;  %v808_v46 = vpop.f32.mrb[23].mxu0 }
 0x730   :  { %v836_v47 = vpop.eup %835 }
 0x731   :  { %585 = vst.msk [vmem:[#allocation3 + $0x38] sm:$0xff] %vm147_vm2, %v836_v47  ;;  %620 = vrot.lane.b32.xlu0 %v836_v47, %s839_s8 }
 0x732   :  { %618 = vst.msk [vmem:[%s1091_s6] sm:$0xff] %vm145_vm3, %v836_v47 }
 0x738   :  { %v587_v49 = vld [vmem:[#allocation3 + $0x38] sm:$0xff] }
 0x739   :  { %v588_v50 = vsel %vm145_vm3, %v586_v48, %v587_v49  ;;  %v616_v51 = vsel %vm145_vm3, %v587_v49, %v586_v48 }
 0x73a   :  { %589 = vst.msk [vmem:[%s1090_s5] sm:$0xff] %vm147_vm2, %v588_v50  ;;  %617 = vst.msk [vmem:[%s1090_s5 + $0x38] sm:$0xff] %vm147_vm2, %v616_v51 }
 0x7a3   :  { %v621_v52 = vpop.permute.xlu0 %620 }
 0x7a4   :  { %623 = vst.msk [vmem:[%s1092_s7] sm:$0xff] %vm145_vm3, %v621_v52 }

</bundles_post_ra>
